<compile_context>
chip_gen: v6e
topology: v6e:2x2x1
jax: 0.10.0
libtpu: 0.0.40
codegen_flags: <defaults>
</compile_context>

<pallas_src>
import jax
import jax.numpy as jnp
from jax.experimental import pallas as pl
from jax.experimental.pallas import tpu as pltpu


_SQRT_HALF = 0.7071067811865476


def _erf(x, approx_rcp):
    # Abramowitz & Stegun 7.1.26 rational approximation (|abs err| <= 1.5e-7).
    # Only exp/mul/add/select (+ optional EUP reciprocal) — always lowers.
    a = jnp.abs(x)
    denom = 1.0 + 0.3275911 * a
    if approx_rcp:
        t = pl.reciprocal(denom, approx=True)   # EUP slot, ~free next to the exp
    else:
        t = 1.0 / denom                         # exact path for tight f32 parity
    poly = t * (0.254829592 + t * (-0.284496736 + t * (1.421413741
               + t * (-1.453152027 + t * 1.061405429))))
    e = 1.0 - poly * jnp.exp(-a * a)
    return jnp.where(x < 0.0, -e, e)


def _gelu_exact(x, approx_rcp):
    # erf-form GELU, matching torch.nn.GELU()'s default (approximate='none').
    return 0.5 * x * (1.0 + _erf(x * _SQRT_HALF, approx_rcp))


def _make_kernel(approx_rcp):
    def residual_ff_kernel(x_ref, w1_ref, b1_ref, w2_ref, b2_ref, o_ref, acc_ref):
        h_idx = pl.program_id(1)

        @pl.when(h_idx == 0)
        def _():
            acc_ref[...] = jnp.zeros_like(acc_ref)

        x = x_ref[...]
        x_mm = x if x.dtype == w1_ref.dtype else x.astype(w1_ref.dtype)
        # Matmul-1 on this hidden chunk, f32 accumulation on the MXU.
        h = jnp.dot(x_mm, w1_ref[...], preferred_element_type=jnp.float32)
        h = _gelu_exact(h + b1_ref[...].astype(jnp.float32), approx_rcp)
        h = h.astype(w2_ref.dtype)              # narrow the live (tm, th) tensor
        # Matmul-2 chunk accumulated into the resident f32 (tm, D) scratch.
        acc_ref[...] += jnp.dot(h, w2_ref[...], preferred_element_type=jnp.float32)

        @pl.when(h_idx == pl.num_programs(1) - 1)
        def _():
            y = acc_ref[...] + b2_ref[...].astype(jnp.float32) + x.astype(jnp.float32)
            o_ref[...] = y.astype(o_ref.dtype)

    return residual_ff_kernel


def _round_up(a, b):
    return (a + b - 1) // b * b


def _num_tensorcores():
    try:
        kind = jax.devices()[0].device_kind.lower()
    except Exception:
        return 1
    # Dual-TensorCore chips: v4 / v5p / v7x. v5e / v6e are single-TC.
    return 2 if ("v4" in kind or "v5p" in kind or "v7" in kind) else 1


def _vmem_capacity_bytes():
    try:
        return int(pltpu.get_tpu_info().vmem_capacity_bytes)
    except Exception:
        return 64 * 2**20   # conservative: valid on every current generation


def _weight_spec(shape, index_map, single_buffer):
    # Grid-constant weight blocks only need one VMEM buffer. Detect support
    # up front (no broad runtime fallback that would double the footprint).
    if single_buffer and hasattr(pl, "Buffered"):
        try:
            return pl.BlockSpec(shape, index_map, pipeline_mode=pl.Buffered(1))
        except TypeError:
            pass
    return pl.BlockSpec(shape, index_map)


def residual_feedforward(x, w1, b1, w2, b2, *, tm=None, th=None, mxu_dtype=None):
    """out = GELU(x @ w1 + b1) @ w2 + b2 + x, fused, tiled over tokens and H.

    x: (B, N, D); w1: (D, H); b1: (1, H); w2: (H, D); b2: (1, D).
    mxu_dtype: optional (e.g. jnp.bfloat16) dtype for the MXU operands when the
    inputs are f32; accumulation and the bias/GELU/residual epilogue stay f32.
    """
    B, N, D = x.shape
    H = w1.shape[1]
    M = B * N
    x2 = x.reshape(M, D)

    if mxu_dtype is not None and jnp.dtype(mxu_dtype) != jnp.dtype(w1.dtype):
        # Cast weights once in the wrapper: halves weight DMA + VMEM footprint.
        w1 = w1.astype(mxu_dtype)
        w2 = w2.astype(mxu_dtype)

    n_tc = _num_tensorcores()
    cap = _vmem_capacity_bytes()
    budget = cap - 8 * 2**20                  # headroom for compiler scratch

    w_item = jnp.dtype(w1.dtype).itemsize
    x_item = jnp.dtype(x2.dtype).itemsize

    # ---- token tile --------------------------------------------------------
    if tm is None:
        tm = 256
        if n_tc > 1 and 2 * D * H * w_item > 16 * 2**20:
            tm = 128                          # VMEM-tight dual-core chips (v7x)
    tm_eff = min(tm, _round_up(M, 8))
    if n_tc > 1:
        # Keep >= 2 grid steps per TensorCore so x/out double-buffering
        # overlaps something; shrink only to MXU-row-aligned (128) tiles.
        min_steps = 2 * n_tc
        if M >= min_steps * 128 and pl.cdiv(M, tm_eff) < min_steps:
            tm_eff = max(128, _round_up(pl.cdiv(M, min_steps), 128))
    Mp = _round_up(M, tm_eff)
    if Mp != M:
        x2 = jnp.pad(x2, ((0, Mp - M), (0, 0)))

    # ---- hidden-chunk tile (reduction axis) --------------------------------
    # Fixed per-step footprint: f32 accumulator + double-buffered x/out + b2.
    fixed = tm_eff * D * 4 + 2 * 2 * tm_eff * D * x_item + D * jnp.dtype(b2.dtype).itemsize

    def chunk_bytes(t, wbuf):
        # wbuf copies of the (D,t)+(t,D) weight chunks and the b1 chunk, plus
        # the compiler-managed (tm, t) hidden intermediates (f32 + narrowed).
        return (wbuf * (2 * D * t * w_item + t * jnp.dtype(b1.dtype).itemsize)
                + tm_eff * t * (4 + w_item))

    if th is None:
        if fixed + chunk_bytes(H, 1) <= 0.75 * budget:
            th_eff = H                        # resident-weight fast path
        else:
            th_eff = 128
            while (2 * th_eff <= min(H, 4096)
                   and fixed + chunk_bytes(2 * th_eff, 2) <= 0.75 * budget):
                th_eff *= 2
    else:
        th_eff = min(int(th), H)
    if th_eff < H:
        th_eff = max(128, _round_up(th_eff, 128))     # lane-aligned chunks
        th_eff = min(th_eff, _round_up(H, 128))
    Hp = _round_up(H, th_eff)
    if Hp != H:
        # Zero padding is exact: GELU(0)=0 and padded W2 rows are zero.
        w1 = jnp.pad(w1, ((0, 0), (0, Hp - H)))
        b1 = jnp.pad(b1, ((0, 0), (0, Hp - H)))
        w2 = jnp.pad(w2, ((0, Hp - H), (0, 0)))
    n_h = Hp // th_eff

    single_buffer = (n_h == 1)                # weight blocks grid-constant
    wbuf = 1 if single_buffer else 2
    need = fixed + chunk_bytes(th_eff, wbuf)
    vmem_limit = int(min(budget, max(32 * 2**20, need + 4 * 2**20)))

    # Approx reciprocal (EUP) only on the loose-tolerance (bf16) paths.
    approx_rcp = (jnp.dtype(x.dtype) != jnp.dtype(jnp.float32)
                  or jnp.dtype(w1.dtype) != jnp.dtype(jnp.float32))

    # TODO(synk): when stacking transformer layers, hide the step-0 weight DMA
    # behind the previous layer via a cross-pallas_call DMA future (P10).

    out = pl.pallas_call(
        _make_kernel(approx_rcp),
        out_shape=jax.ShapeDtypeStruct((Mp, D), x.dtype),
        grid_spec=pltpu.PrefetchScalarGridSpec(
            num_scalar_prefetch=0,
            grid=(Mp // tm_eff, n_h),
            in_specs=[
                pl.BlockSpec((tm_eff, D), lambda i, h: (i, 0)),                  # x tile
                _weight_spec((D, th_eff), lambda i, h: (0, h), single_buffer),   # W1 chunk
                _weight_spec((1, th_eff), lambda i, h: (0, h), single_buffer),   # b1 chunk
                _weight_spec((th_eff, D), lambda i, h: (h, 0), single_buffer),   # W2 chunk
                _weight_spec((1, D), lambda i, h: (0, 0), True),                 # b2 (const)
            ],
            out_specs=pl.BlockSpec((tm_eff, D), lambda i, h: (i, 0)),
            scratch_shapes=[pltpu.VMEM((tm_eff, D), jnp.float32)],
        ),
        compiler_params=pltpu.CompilerParams(
            dimension_semantics=("parallel", "arbitrary"),
            vmem_limit_bytes=vmem_limit),
    )(x2, w1, b1, w2, b2)

    if Mp != M:
        out = out[:M]
    return out.reshape(B, N, D)


def residual_feedforward_ref(x, w1, b1, w2, b2):
    # Exact erf GELU, matching torch.nn.GELU()'s default.
    h = jax.nn.gelu(jnp.dot(x, w1) + b1[0], approximate=False)
    return jnp.dot(h, w2) + b2[0] + x


if __name__ == "__main__":
    key = jax.random.PRNGKey(0)

    def make(B, N, D, H, dtype):
        kx, k1, k2, k3, k4 = jax.random.split(key, 5)
        x = jax.random.normal(kx, (B, N, D), dtype=jnp.float32)
        # "Linear" params stored as (in, out), i.e. PyTorch weight.T.
        w1 = jax.random.normal(k1, (D, H), dtype=jnp.float32) * 0.05
        b1 = jax.random.normal(k2, (1, H), dtype=jnp.float32) * 0.01
        w2 = jax.random.normal(k3, (H, D), dtype=jnp.float32) * 0.05
        b2 = jax.random.normal(k4, (1, D), dtype=jnp.float32) * 0.01
        return tuple(a.astype(dtype) for a in (x, w1, b1, w2, b2))

    # 1) f32, resident-weight path (exact erf poly + exact reciprocal).
    args = make(2, 8, 32, 64, jnp.float32)
    out = jax.block_until_ready(residual_feedforward(*args))
    ref = residual_feedforward_ref(*args)
    assert out.shape == args[0].shape and out.dtype == args[0].dtype
    assert jnp.allclose(out, ref, atol=1e-4, rtol=1e-4)

    # 2) f32, forced H-chunked reduction path (th=128 over H=256) — exercises
    #    the accumulator grid axis + pl.when epilogue with tight tolerance.
    args = make(2, 8, 64, 256, jnp.float32)
    out = jax.block_until_ready(residual_feedforward(*args, th=128))
    ref = residual_feedforward_ref(*args)
    assert jnp.allclose(out, ref, atol=1e-4, rtol=1e-4)

    # 3) bf16 end-to-end (bf16 MXU operands, f32 accumulation + epilogue).
    argsb = make(2, 8, 32, 64, jnp.bfloat16)
    outb = jax.block_until_ready(residual_feedforward(*argsb))
    refb = residual_feedforward_ref(*(a.astype(jnp.float32) for a in argsb))
    assert outb.shape == argsb[0].shape and outb.dtype == jnp.bfloat16
    assert jnp.allclose(outb.astype(jnp.float32), refb, atol=1e-1, rtol=1e-1)

    # 4) f32 activations with opt-in bf16 MXU operands (v6e/v7x fast path).
    args = make(2, 8, 32, 64, jnp.float32)
    out = jax.block_until_ready(
        residual_feedforward(*args, mxu_dtype=jnp.bfloat16))
    ref = residual_feedforward_ref(*args)
    assert out.dtype == jnp.float32
    assert jnp.allclose(out, ref, atol=1e-1, rtol=1e-1)

    print("KERNEL_OK")
</pallas_src>

<mosaic_0001>
module attributes {stable_mosaic.version = 11 : i64} {
  func.func @residual_ff_kernel(%arg0: i32, %arg1: i32, %arg2: memref<16x32xf32, #tpu.memory_space<vmem>>, %arg3: memref<32x64xf32, #tpu.memory_space<vmem>>, %arg4: memref<1x64xf32, #tpu.memory_space<vmem>>, %arg5: memref<64x32xf32, #tpu.memory_space<vmem>>, %arg6: memref<1x32xf32, #tpu.memory_space<vmem>>, %arg7: memref<16x32xf32, #tpu.memory_space<vmem>>, %arg8: memref<16x32xf32, #tpu.memory_space<vmem>>) attributes {dimension_semantics = [#tpu.dimension_semantics<parallel>, #tpu.dimension_semantics<arbitrary>], iteration_bounds = array<i64: 1, 1>, scalar_prefetch = 0 : i64, scratch_operands = 1 : i64, tpu.core_type = #tpu.core_type<tc>, window_params = [{transform_indices = @transform_0, window_bounds = array<i64: 16, 32>}, {pipeline_mode = #tpu.pipeline_mode<synchronous>, transform_indices = @transform_1, window_bounds = array<i64: 32, 64>}, {pipeline_mode = #tpu.pipeline_mode<synchronous>, transform_indices = @transform_2, window_bounds = array<i64: 1, 64>}, {pipeline_mode = #tpu.pipeline_mode<synchronous>, transform_indices = @transform_3, window_bounds = array<i64: 64, 32>}, {pipeline_mode = #tpu.pipeline_mode<synchronous>, transform_indices = @transform_4, window_bounds = array<i64: 1, 32>}, {transform_indices = @transform_5, window_bounds = array<i64: 16, 32>}]} {
    %c0_i32 = arith.constant 0 : i32
    %0 = arith.cmpi eq, %arg1, %c0_i32 : i32
    %1 = arith.extui %0 : i1 to i32
    %c0_i32_0 = arith.constant 0 : i32
    %2 = arith.cmpi ne, %1, %c0_i32_0 : i32
    scf.if %2 {
      %cst_30 = arith.constant 0.000000e+00 : f32
      %57 = vector.broadcast %cst_30 : f32 to vector<16x32xf32>
      %c0_31 = arith.constant 0 : index
      %c0_32 = arith.constant 0 : index
      %58 = vector.load %arg8[%c0_31, %c0_32] : memref<16x32xf32, #tpu.memory_space<vmem>>, vector<16x32xf32>
      tpu.vector_store %arg8[%c0_31, %c0_32], %57 {strides = array<i32>} : memref<16x32xf32, #tpu.memory_space<vmem>>, vector<16x32xf32>,
    } else {
    }
    %c0 = arith.constant 0 : index
    %c0_1 = arith.constant 0 : index
    %3 = vector.load %arg2[%c0, %c0_1] : memref<16x32xf32, #tpu.memory_space<vmem>>, vector<16x32xf32>
    %c0_2 = arith.constant 0 : index
    %c0_3 = arith.constant 0 : index
    %4 = vector.load %arg3[%c0_2, %c0_3] : memref<32x64xf32, #tpu.memory_space<vmem>>, vector<32x64xf32>
    %cst = arith.constant dense<0.000000e+00> : vector<16x64xf32>
    %5 = tpu.matmul %3, %4, %cst {dimension_numbers = #tpu.dot_dimension_numbers<[1], [0], [0], [1], [0, 0, 1, 1], [], []>} : vector<16x32xf32>, vector<32x64xf32>, vector<16x64xf32> -> vector<16x64xf32>
    %c0_4 = arith.constant 0 : index
    %c0_5 = arith.constant 0 : index
    %6 = vector.load %arg4[%c0_4, %c0_5] : memref<1x64xf32, #tpu.memory_space<vmem>>, vector<1x64xf32>
    %7 = vector.broadcast %6 : vector<1x64xf32> to vector<16x64xf32>
    %8 = arith.addf %5, %7 : vector<16x64xf32>
    %cst_6 = arith.constant 5.000000e-01 : f32
    %9 = vector.broadcast %cst_6 : f32 to vector<16x64xf32>
    %10 = arith.mulf %9, %8 : vector<16x64xf32>
    %cst_7 = arith.constant 0.707106769 : f32
    %11 = vector.broadcast %cst_7 : f32 to vector<16x64xf32>
    %12 = arith.mulf %8, %11 : vector<16x64xf32>
    %13 = math.absf %12 : vector<16x64xf32>
    %cst_8 = arith.constant 0.327591091 : f32
    %14 = vector.broadcast %cst_8 : f32 to vector<16x64xf32>
    %15 = arith.mulf %14, %13 : vector<16x64xf32>
    %cst_9 = arith.constant 1.000000e+00 : f32
    %16 = vector.broadcast %cst_9 : f32 to vector<16x64xf32>
    %17 = arith.addf %16, %15 : vector<16x64xf32>
    %cst_10 = arith.constant 1.000000e+00 : f32
    %18 = vector.broadcast %cst_10 : f32 to vector<16x64xf32>
    %19 = arith.divf %18, %17 : vector<16x64xf32>
    %cst_11 = arith.constant 1.06140542 : f32
    %20 = vector.broadcast %cst_11 : f32 to vector<16x64xf32>
    %21 = arith.mulf %19, %20 : vector<16x64xf32>
    %cst_12 = arith.constant -1.45315206 : f32
    %22 = vector.broadcast %cst_12 : f32 to vector<16x64xf32>
    %23 = arith.addf %22, %21 : vector<16x64xf32>
    %24 = arith.mulf %19, %23 : vector<16x64xf32>
    %cst_13 = arith.constant 1.42141378 : f32
    %25 = vector.broadcast %cst_13 : f32 to vector<16x64xf32>
    %26 = arith.addf %25, %24 : vector<16x64xf32>
    %27 = arith.mulf %19, %26 : vector<16x64xf32>
    %cst_14 = arith.constant -0.284496725 : f32
    %28 = vector.broadcast %cst_14 : f32 to vector<16x64xf32>
    %29 = arith.addf %28, %27 : vector<16x64xf32>
    %30 = arith.mulf %19, %29 : vector<16x64xf32>
    %cst_15 = arith.constant 0.254829586 : f32
    %31 = vector.broadcast %cst_15 : f32 to vector<16x64xf32>
    %32 = arith.addf %31, %30 : vector<16x64xf32>
    %33 = arith.mulf %19, %32 : vector<16x64xf32>
    %cst_16 = arith.constant 0.000000e+00 : f32
    %34 = vector.broadcast %cst_16 : f32 to vector<16x64xf32>
    %35 = arith.subf %34, %13 : vector<16x64xf32>
    %36 = arith.mulf %35, %13 : vector<16x64xf32>
    %37 = math.exp %36 : vector<16x64xf32>
    %38 = arith.mulf %33, %37 : vector<16x64xf32>
    %cst_17 = arith.constant 1.000000e+00 : f32
    %39 = vector.broadcast %cst_17 : f32 to vector<16x64xf32>
    %40 = arith.subf %39, %38 : vector<16x64xf32>
    %cst_18 = arith.constant 0.000000e+00 : f32
    %41 = vector.broadcast %cst_18 : f32 to vector<16x64xf32>
    %42 = arith.cmpf olt, %12, %41 : vector<16x64xf32>
    %cst_19 = arith.constant 0.000000e+00 : f32
    %43 = vector.broadcast %cst_19 : f32 to vector<16x64xf32>
    %44 = arith.subf %43, %40 : vector<16x64xf32>
    %45 = arith.select %42, %44, %40 : vector<16x64xi1>, vector<16x64xf32>
    %cst_20 = arith.constant 1.000000e+00 : f32
    %46 = vector.broadcast %cst_20 : f32 to vector<16x64xf32>
    %47 = arith.addf %46, %45 : vector<16x64xf32>
    %48 = arith.mulf %10, %47 : vector<16x64xf32>
    %c0_21 = arith.constant 0 : index
    %c0_22 = arith.constant 0 : index
    %49 = vector.load %arg8[%c0_21, %c0_22] : memref<16x32xf32, #tpu.memory_space<vmem>>, vector<16x32xf32>
    %c0_23 = arith.constant 0 : index
    %c0_24 = arith.constant 0 : index
    %50 = vector.load %arg5[%c0_23, %c0_24] : memref<64x32xf32, #tpu.memory_space<vmem>>, vector<64x32xf32>
    %cst_25 = arith.constant dense<0.000000e+00> : vector<16x32xf32>
    %51 = tpu.matmul %48, %50, %cst_25 {dimension_numbers = #tpu.dot_dimension_numbers<[1], [0], [0], [1], [0, 0, 1, 1], [], []>} : vector<16x64xf32>, vector<64x32xf32>, vector<16x32xf32> -> vector<16x32xf32>
    %52 = arith.addf %49, %51 : vector<16x32xf32>
    %c0_26 = arith.constant 0 : index
    %c0_27 = arith.constant 0 : index
    %53 = vector.load %arg8[%c0_26, %c0_27] : memref<16x32xf32, #tpu.memory_space<vmem>>, vector<16x32xf32>
    tpu.vector_store %arg8[%c0_26, %c0_27], %52 {strides = array<i32>} : memref<16x32xf32, #tpu.memory_space<vmem>>, vector<16x32xf32>,
    %c0_i32_28 = arith.constant 0 : i32
    %54 = arith.cmpi eq, %arg1, %c0_i32_28 : i32
    %55 = arith.extui %54 : i1 to i32
    %c0_i32_29 = arith.constant 0 : i32
    %56 = arith.cmpi ne, %55, %c0_i32_29 : i32
    scf.if %56 {
      %c0_30 = arith.constant 0 : index
      %c0_31 = arith.constant 0 : index
      %57 = vector.load %arg8[%c0_30, %c0_31] : memref<16x32xf32, #tpu.memory_space<vmem>>, vector<16x32xf32>
      %c0_32 = arith.constant 0 : index
      %c0_33 = arith.constant 0 : index
      %58 = vector.load %arg6[%c0_32, %c0_33] : memref<1x32xf32, #tpu.memory_space<vmem>>, vector<1x32xf32>
      %59 = vector.broadcast %58 : vector<1x32xf32> to vector<16x32xf32>
      %60 = arith.addf %57, %59 : vector<16x32xf32>
      %61 = arith.addf %60, %3 : vector<16x32xf32>
      %c0_34 = arith.constant 0 : index
      %c0_35 = arith.constant 0 : index
      %62 = vector.load %arg7[%c0_34, %c0_35] : memref<16x32xf32, #tpu.memory_space<vmem>>, vector<16x32xf32>
      tpu.vector_store %arg7[%c0_34, %c0_35], %61 {strides = array<i32>} : memref<16x32xf32, #tpu.memory_space<vmem>>, vector<16x32xf32>,
    } else {
    }
    return
  }
  func.func @transform_0(%arg0: i32, %arg1: i32) -> (i32, i32) {
    %c0_i32 = arith.constant 0 : i32
    %c0_i32_0 = arith.constant 0 : i32
    return %arg0, %c0_i32 : i32, i32
  }
  func.func @transform_1(%arg0: i32, %arg1: i32) -> (i32, i32) {
    %c0_i32 = arith.constant 0 : i32
    %c0_i32_0 = arith.constant 0 : i32
    return %c0_i32, %arg1 : i32, i32
  }
  func.func @transform_2(%arg0: i32, %arg1: i32) -> (i32, i32) {
    %c0_i32 = arith.constant 0 : i32
    %c0_i32_0 = arith.constant 0 : i32
    return %c0_i32, %arg1 : i32, i32
  }
  func.func @transform_3(%arg0: i32, %arg1: i32) -> (i32, i32) {
    %c0_i32 = arith.constant 0 : i32
    %c0_i32_0 = arith.constant 0 : i32
    return %arg1, %c0_i32 : i32, i32
  }
  func.func @transform_4(%arg0: i32, %arg1: i32) -> (i32, i32) {
    %c0_i32 = arith.constant 0 : i32
    %c0_i32_0 = arith.constant 0 : i32
    %c0_i32_1 = arith.constant 0 : i32
    return %c0_i32, %c0_i32_0 : i32, i32
  }
  func.func @transform_5(%arg0: i32, %arg1: i32) -> (i32, i32) {
    %c0_i32 = arith.constant 0 : i32
    %c0_i32_0 = arith.constant 0 : i32
    return %arg0, %c0_i32 : i32, i32
  }
}

</mosaic_0001>

<bundles_post_ra>
// kernel: tpu_custom_call.1
= control target key start
LH: loop header
LB: loop body
LE: loop exit
PB: predicated region body
PF: predicated region fallthrough
CT: control target
= control target key end

     0   :  { %vm25_vm0 = vcmask 261120   ;;  %s494_s0 = inlined_call_operand.vmem [shape: f32[16,32], index: 0, kind: input, shape index: {}]   ;;  %s495_s1 = inlined_call_operand.vmem [shape: f32[32,64], index: 1, kind: input, shape index: {}]   ;;  %s496_s2 = inlined_call_operand.vmem [shape: f32[1,64], index: 2, kind: input, shape index: {}]   ;;  %s497_s3 = inlined_call_operand.vmem [shape: f32[64,32], index: 3, kind: input, shape index: {}]   ;;  %s498_s4 = inlined_call_operand.vmem [shape: f32[1,32], index: 4, kind: input, shape index: {}]   ;;  %s499_s5 = inlined_call_operand.hbm [shape: f32[16,32], index: 5, kind: output, shape index: {}]  }
   0x1   :  { %v33_v0 = vld [vmem:[%s495_s1 + $0x18] sm:$0xff]  ;;  %v32_v1 = vld [vmem:[%s495_s1 + $0x10] sm:$0xff]  ;;  %v436_v2 = vld [vmem:[%s494_s0] sm:$0xff] }
   0x2   :  { %329 = vmatprep.subr.mxu0 %v33_v0  ;;  %v31_v3 = vld [vmem:[%s495_s1 + $0x8] sm:$0xff]  ;;  %337 = vmatprep.mubr.msk.f32.mxu0 %vm25_vm0, %v436_v2 }
   0x3   :  { %330 = vmatpush3.msra.mxu0 %v33_v0 }
   0x4   :  { %10 = vsyncpa [#allocation4], 0  ;;  %331 = vmatprep.subr.mxu0 %v32_v1  ;;  %v30_v4 = vld [vmem:[%s495_s1] sm:$0xff]  ;;  %v449_v5 = vld [vmem:[%s494_s0 + $0x8] sm:$0xff]  ;;  %v393_v14 = vmov 0.0   ;;  %vm187_vm3 = vcmask 523264  }
   0x5   :  { %332 = vmatpush3.msra.mxu0 %v32_v1  ;;  %v186_v6 = vld [vmem:[%s497_s3 + $0x38] sm:$0xff]  ;;  %v185_v7 = vld [vmem:[%s497_s3 + $0x30] sm:$0xff]  ;;  %v184_v8 = vld [vmem:[%s497_s3 + $0x28] sm:$0xff]  ;;  %27 = vst.msk [vmem:[#allocation2 + $0x8] sm:$0xff] %vm25_vm0, %v393_v14  ;;  %s394_s21 = smov [#allocation3]  }
   0x6   :  { %333 = vmatprep.subr.mxu0 %v31_v3  ;;  %340 = vmatprep.subr.mxu1 %v186_v6  ;;  %v183_v9 = vld [vmem:[%s497_s3 + $0x20] sm:$0xff]  ;;  %v182_v10 = vld [vmem:[%s497_s3 + $0x18] sm:$0xff]  ;;  %v181_v11 = vld [vmem:[%s497_s3 + $0x10] sm:$0xff]  ;;  %26 = vst.msk [vmem:[#allocation2] sm:$0xff] %vm25_vm0, %v393_v14  ;;  %s296_s22 = sshll.u32 %s394_s21, 4  ;;  %s297_s22 = int_to_ptr.vmem [resolvable:$true] %s296_s22 }
   0x7   :  { %334 = vmatpush3.msra.mxu0 %v31_v3  ;;  %341 = vmatpush3.msra.mxu1 %v186_v6  ;;  %v180_v12 = vld [vmem:[%s497_s3 + $0x8] sm:$0xff]  ;;  %v179_v13 = vld [vmem:[%s497_s3] sm:$0xff]  ;;  %s371_s23 = scalar_lea.vmem %s297_s22, 256  ;;  %p376_p1 = scmp.lt.s32.totalorder %s297_s22, %s297_s22 }
   0x8   :  { %335 = vmatprep.subr.mxu0 %v30_v4  ;;  %342 = vmatprep.subr.mxu1 %v185_v7  ;;  %v307_v15 = vld [vmem:[%s496_s2] ss:$0 sm:$0xff]  ;;  %p372_p0 = scmp.ne.s32.totalorder %s297_s22, %s371_s23  ;;  %p377_p2 = scmp.lt.s32.totalorder %s371_s23, %s371_s23 }
   0x9   :  { %336 = vmatpush3.msra.mxu0 %v30_v4  ;;  %343 = vmatpush3.msra.mxu1 %v185_v7  ;;  %v312_v14 = vld [vmem:[%s498_s4] ss:$0 sm:$0xff] }
   0xa   :  { %338 = vmatmul.mubr.msk.f32.vlgmr.msra.gmra.mxu0 %vm25_vm0, %v449_v5  ;;  %344 = vmatprep.subr.mxu1 %v184_v8  ;;  %p378_p3 = por %p377_p2, %p376_p1 }
   0xb   :  { %345 = vmatpush3.msra.mxu1 %v184_v8 }
   0xc   :  { %346 = vmatprep.subr.mxu1 %v183_v9  ;;  %v178_v8 = vld [vmem:[#allocation2 + $0x8] sm:$0xff]  ;;  %p379_p4 = pnand %p378_p3, %p372_p0 }
   0xd   :  { %347 = vmatpush3.msra.mxu1 %v183_v9 }
   0xe   :  { %348 = vmatprep.subr.mxu1 %v182_v10 }
   0xf   :  { %349 = vmatpush3.msra.mxu1 %v182_v10  ;;  %v177_v10 = vld [vmem:[#allocation2] sm:$0xff] }
  0x10   :  { %350 = vmatprep.subr.mxu1 %v181_v11 }
  0x11   :  { %351 = vmatpush3.msra.mxu1 %v181_v11 }
  0x12   :  { %352 = vmatprep.subr.mxu1 %v180_v12 }
  0x13   :  { %353 = vmatpush3.msra.mxu1 %v180_v12 }
  0x14   :  { %354 = vmatprep.subr.mxu1 %v179_v13 }
  0x15   :  { %355 = vmatpush3.msra.mxu1 %v179_v13 }
  0xca   :  { %v339_v16 = vpop.f32.mrf.mxu0 }
  0xcb   :  { %v120_v17 = vadd.f32 %v339_v16, %v307_v15 }
  0xcc   :  { %v114_v18 = vpop.f32.mrf.mxu0 }
  0xcd   :  { %v126_v19 = vmul.f32 0.70710677, %v120_v17  ;;  %v115_v20 = vadd.f32 %v307_v15, %v114_v18  ;;  %v124_v4 = vmul.f32 0.5, %v120_v17 }
  0xcf   :  { %v128_v21 = vand.u32 2147483647, %v126_v19  ;;  %v125_v22 = vmul.f32 0.70710677, %v115_v20  ;;  %vm168_vm1 = vcmp.lt.f32.partialorder %v126_v19, 0.0  ;;  %v123_v1 = vmul.f32 0.5, %v115_v20 }
  0xd1   :  { %v130_v23 = vmul.f32 0.3275911, %v128_v21  ;;  %v127_v24 = vand.u32 2147483647, %v125_v22  ;;  %v156_v28 = vsub.f32 0.0, %v128_v21  ;;  %vm167_vm2 = vcmp.lt.f32.partialorder %v125_v22, 0.0 }
  0xd3   :  { %v132_v25 = vadd.f32 1.0, %v130_v23  ;;  %v129_v26 = vmul.f32 0.3275911, %v127_v24  ;;  %v155_v29 = vsub.f32 0.0, %v127_v24  ;;  %v158_v30 = vmul.f32 %v156_v28, %v128_v21 }
  0xd5   :  { %363 = vrcp.f32 %v132_v25  ;;  %v131_v27 = vadd.f32 1.0, %v129_v26  ;;  %v157_v32 = vmul.f32 %v155_v29, %v127_v24  ;;  %v161_v34 = vmul.f32 1.442695, %v158_v30 }
  0xd7   :  { %365 = vrcp.f32 %v131_v27  ;;  %v159_v37 = vmul.f32 1.442695, %v157_v32 }
  0xd8   :  { %367 = vpow2.f32 %v161_v34 }
  0xd9   :  { %369 = vpow2.f32 %v159_v37 }
  0xe2   :  { %v364_v31 = vpop.eup %363 }
  0xe3   :  { %v138_v33 = vmul.f32 1.0614054, %v364_v31 }
  0xe4   :  { %v366_v35 = vpop.eup %365 }
  0xe5   :  { %v140_v36 = vadd.f32 -1.4531521, %v138_v33  ;;  %v137_v38 = vmul.f32 1.0614054, %v366_v35  ;;  %v368_v52 = vpop.eup %367 }
  0xe6   :  { %v370_v56 = vpop.eup %369 }
  0xe7   :  { %v142_v39 = vmul.f32 %v364_v31, %v140_v36  ;;  %v139_v40 = vadd.f32 -1.4531521, %v137_v38 }
  0xe9   :  { %v144_v41 = vadd.f32 1.4214138, %v142_v39  ;;  %v141_v42 = vmul.f32 %v366_v35, %v139_v40 }
  0xeb   :  { %v146_v43 = vmul.f32 %v364_v31, %v144_v41  ;;  %v143_v44 = vadd.f32 1.4214138, %v141_v42 }
  0xed   :  { %v148_v45 = vadd.f32 -0.28449672, %v146_v43  ;;  %v145_v46 = vmul.f32 %v366_v35, %v143_v44 }
  0xef   :  { %v150_v47 = vmul.f32 %v364_v31, %v148_v45  ;;  %v147_v48 = vadd.f32 -0.28449672, %v145_v46 }
  0xf1   :  { %v152_v49 = vadd.f32 0.2548296, %v150_v47  ;;  %v149_v50 = vmul.f32 %v366_v35, %v147_v48 }
  0xf3   :  { %v154_v51 = vmul.f32 %v364_v31, %v152_v49  ;;  %v151_v53 = vadd.f32 0.2548296, %v149_v50 }
  0xf5   :  { %v164_v54 = vmul.f32 %v368_v52, %v154_v51  ;;  %v153_v55 = vmul.f32 %v366_v35, %v151_v53 }
  0xf7   :  { %v166_v57 = vsub.f32 1.0, %v164_v54  ;;  %v163_v58 = vmul.f32 %v370_v56, %v153_v55 }
  0xf9   :  { %v170_v59 = vsub.f32 0.0, %v166_v57  ;;  %v165_v60 = vsub.f32 1.0, %v163_v58 }
  0xfb   :  { %v172_v61 = vsel %vm168_vm1, %v170_v59, %v166_v57  ;;  %v169_v62 = vsub.f32 0.0, %v165_v60 }
  0xfc   :  { %v174_v63 = vadd.f32 1.0, %v172_v61 }
  0xfd   :  { %v171_v0 = vsel %vm167_vm2, %v169_v62, %v165_v60 }
  0xfe   :  { %v173_v3 = vadd.f32 1.0, %v171_v0  ;;  %v176_v7 = vmul.f32 %v174_v63, %v124_v4 }
 0x100   :  { %v175_v6 = vmul.f32 %v173_v3, %v123_v1 }
 0x102   :  { %356 = vmatprep.mubr.msk.f32.mxu1 %vm187_vm3, %v175_v6 }
 0x103   :  { %357 = vmatmul.mubr.msk.f32.vlgmr.msra.gmra.mxu1 %vm187_vm3, %v176_v7 }
 0x1c3   :  { %v358_v9 = vpop.f32.mrf.mxu1 }
 0x1c4   :  { %v270_v11 = vadd.f32 %v358_v9, %v178_v8 }
 0x1c5   :  { %v260_v12 = vpop.f32.mrf.mxu1 }
 0x1c6   :  { %272 = vst.msk [vmem:[#allocation2 + $0x8] sm:$0xff] %vm25_vm0, %v270_v11  ;;  %v269_v13 = vadd.f32 %v260_v12, %v177_v10 }
 0x1c8   :  { %271 = vst.msk [vmem:[#allocation2] sm:$0xff] %vm25_vm0, %v269_v13 }
 0x1cd   :  { %v277_v15 = vld [vmem:[#allocation2 + $0x8] sm:$0xff] }
 0x1ce   :  { %v286_v16 = vadd.f32 %v312_v14, %v277_v15 }
 0x1cf   :  { %v276_v17 = vld [vmem:[#allocation2] sm:$0xff] }
 0x1d0   :  { %v285_v18 = vadd.f32 %v312_v14, %v276_v17  ;;  %v288_v19 = vadd.f32 %v286_v16, %v449_v5 }
 0x1d2   :  { %v287_v20 = vadd.f32 %v285_v18, %v436_v2  ;;  %290 = vst.msk [vmem:[#allocation3 + $0x8] sm:$0xff] %vm25_vm0, %v288_v19 }
 0x1d4   :  { %289 = vst.msk [vmem:[#allocation3] sm:$0xff] %vm25_vm0, %v287_v20 }
 0x1d5   :  { %382 = shalt.err (!%p379_p4)
}
 0x1d6   :  { %s395_s4 = smov 128   ;;  %s396_s24 = smov 8  }
 0x1d7   :  { %302 = dma.vmem_to_hbm [thread:$0]  %s297_s22, 256, %s499_s5, [#allocation4], %s395_s4, %s395_s4, %s396_s24  }
 0x1d8   :  { %391 = dma.done.wait [#allocation4], 256  }
 0x1d9   :  { %392 = vsyncadd [#allocation4], 4294967040 }
 0x1da   :  { %306 = vsyncpa [#allocation4], 1 }

</bundles_post_ra>
